<compile_context>
chip_gen: v7x
topology: tpu7x:2x2x1
jax: 0.10.0
libtpu: 0.0.40
codegen_flags: <defaults>
</compile_context>

<pallas_src>
import functools
import math

import jax
import jax.numpy as jnp
from jax.experimental import pallas as pl
from jax.experimental.pallas import tpu as pltpu

LANES = 128       # TPU lane width: last dim of every streamed block
_SUBLANES = 8     # f32 sublane tile


def _round_up(x, m):
    return -(-x // m) * m


def _cdiv(a, b):
    return -(-a // b)


# ----------------------------------------------------------------------------
# Kernel 1: scale-and-shift alignment + squared difference (tiled elementwise).
# ----------------------------------------------------------------------------
def _align_diff_kernel(pred_ref, target_ref, t_pred_ref, t_target_ref,
                       inv_s_pred_ref, inv_s_target_ref, diff_ref):
    p = pred_ref[...].astype(jnp.float32)          # (B, TR, 128)
    t = target_ref[...].astype(jnp.float32)
    pa = (p - t_pred_ref[...]) * inv_s_pred_ref[...]        # (B,1,1) broadcast
    ta = (t - t_target_ref[...]) * inv_s_target_ref[...]
    d = pa - ta
    diff_ref[...] = d * d


# ----------------------------------------------------------------------------
# Kernel 2: masked, thresholded accumulating reduction over the row-tile axis.
# Grid (2, n_half): axis 0 "parallel" (2-way TensorCore split on v7x), axis 1
# "arbitrary".  Outputs are per-core (1, 8, 128) resident vector accumulators.
# ----------------------------------------------------------------------------
def _masked_mean_kernel(thr_ref, diff_ref, mask_ref, sum_ref, cnt_ref, *,
                        n_valid, tile_rows, n_blocks):
    c = pl.program_id(0)
    i = pl.program_id(1)
    n_inner = pl.num_programs(1)

    @pl.when(i == 0)
    def _init():
        sum_ref[...] = jnp.zeros_like(sum_ref)
        cnt_ref[...] = jnp.zeros_like(cnt_ref)

    d = diff_ref[...]                                  # (B, TR, 128) f32
    m = mask_ref[...].astype(jnp.float32)              # int8 {0,1} -> f32
    thr = thr_ref[0]                                   # scalar from SMEM

    # Global flat per-row index of every element: row*128 + lane.  Uses the
    # UNCLAMPED block index, so lane/row padding — and the duplicate clamped
    # block when n_blocks is odd — contribute nothing.
    blk = c * n_inner + i
    row = blk * tile_rows + jax.lax.broadcasted_iota(jnp.int32, d.shape, 1)
    lane = jax.lax.broadcasted_iota(jnp.int32, d.shape, 2)
    valid = (row * LANES + lane) < n_valid

    dm = d * m                                         # diff * mask (binary mask)
    keep = jnp.logical_and(dm < thr, valid)
    kept = jnp.where(keep, dm, 0.0)

    # (B, TR, 128) -> (B*TR/8, 8, 128); the leading-axis sum is elementwise
    # vreg adds (pure VALU), accumulated into the resident output block.
    sum_ref[...] += jnp.sum(kept.reshape(-1, _SUBLANES, LANES),
                            axis=0, keepdims=True)
    cnt_ref[...] += jnp.sum(keep.astype(jnp.float32).reshape(-1, _SUBLANES, LANES),
                            axis=0, keepdims=True)


def ssi_loss(pred, target, mask, *, tile_rows=None):
    """Pallas implementation of SSILoss.forward (NCHW inputs)."""
    B, C, H, W = pred.shape
    N = C * H * W

    pred2 = pred.reshape(B, N)                 # native dtype, streamed as-is
    target2 = target.reshape(B, N)
    # Binary validity mask streamed as int8 (assumes mask in {0,1}).
    mask_i8 = (mask.reshape(B, N) != 0).astype(jnp.int8)

    # --- per-row median (lower median == torch.median) and scale, in XLA ---
    # TODO(synk): replace these sorts with a streaming radix-select kernel.
    p32 = pred2.astype(jnp.float32)
    t32 = target2.astype(jnp.float32)
    med_idx = (N - 1) // 2
    med = jnp.sort(jnp.concatenate([p32, t32], axis=0), axis=1)
    med = med[:, med_idx:med_idx + 1]                    # (2B, 1)
    t_pred, t_target = med[:B], med[B:]
    s_pred = jnp.mean(jnp.abs(p32 - t_pred), axis=1, keepdims=True)
    s_target = jnp.mean(jnp.abs(t32 - t_target), axis=1, keepdims=True)
    inv_s_pred = 1.0 / s_pred        # NOTE: no zero guard — matches reference.
    inv_s_target = 1.0 / s_target

    # --- (B, rows, 128) streamed layout + row-tile sizing ---
    n_rows = _cdiv(N, LANES)
    if tile_rows is None:
        # ~2 MiB of f32 per (B, TR, 128) block; >=2 blocks for the core split.
        rows_target = max(32, (2 * 1024 * 1024) // (B * LANES * 4))
        nb_target = max(2, _cdiv(n_rows, rows_target))
        tr = _round_up(_cdiv(n_rows, nb_target), 32)
    else:
        tr = _round_up(max(int(tile_rows), 32), 32)
    tr = min(tr, _round_up(n_rows, 32))
    n_rows_pad = _round_up(n_rows, tr)
    n_pad = n_rows_pad * LANES
    n_blocks = n_rows_pad // tr

    def to3d(x):
        if n_pad != N:
            x = jnp.pad(x, ((0, 0), (0, n_pad - N)))
        return x.reshape(B, n_rows_pad, LANES)

    pred3 = to3d(pred2)
    target3 = to3d(target2)
    mask3 = to3d(mask_i8)

    def coef(x):
        return x.reshape(B, 1, 1).astype(jnp.float32)

    # --- kernel 1: aligned squared difference ---
    diff3 = pl.pallas_call(
        _align_diff_kernel,
        out_shape=jax.ShapeDtypeStruct((B, n_rows_pad, LANES), jnp.float32),
        grid=(n_blocks,),
        in_specs=[
            pl.BlockSpec((B, tr, LANES), lambda i: (0, i, 0)),
            pl.BlockSpec((B, tr, LANES), lambda i: (0, i, 0)),
            pl.BlockSpec((B, 1, 1), lambda i: (0, 0, 0)),
            pl.BlockSpec((B, 1, 1), lambda i: (0, 0, 0)),
            pl.BlockSpec((B, 1, 1), lambda i: (0, 0, 0)),
            pl.BlockSpec((B, 1, 1), lambda i: (0, 0, 0)),
        ],
        out_specs=pl.BlockSpec((B, tr, LANES), lambda i: (0, i, 0)),
        compiler_params=pltpu.CompilerParams(
            dimension_semantics=("parallel",),
            vmem_limit_bytes=32 * 1024 * 1024),
    )(pred3, target3, coef(t_pred), coef(t_target),
      coef(inv_s_pred), coef(inv_s_target))

    # --- np.percentile(diff, 50), linear interpolation, over UNMASKED diff ---
    # TODO(synk): exact 50th percentile needs a global sort; it stays in XLA.
    diff_flat = diff3.reshape(B, n_pad)[:, :N].reshape(-1)
    M = B * N
    pos = 0.5 * (M - 1)
    lo = int(math.floor(pos))
    hi = int(math.ceil(pos))
    frac = pos - lo
    sd = jnp.sort(diff_flat)
    threshold = ((1.0 - frac) * sd[lo] + frac * sd[hi]).astype(jnp.float32)
    threshold = threshold.reshape(1)

    # --- kernel 2: masked, thresholded sum & count ---
    n_half = (n_blocks + 1) // 2
    sum_p, cnt_p = pl.pallas_call(
        functools.partial(_masked_mean_kernel,
                          n_valid=N, tile_rows=tr, n_blocks=n_blocks),
        out_shape=(
            jax.ShapeDtypeStruct((2, _SUBLANES, LANES), jnp.float32),
            jax.ShapeDtypeStruct((2, _SUBLANES, LANES), jnp.float32),
        ),
        grid=(2, n_half),
        in_specs=[
            pl.BlockSpec(memory_space=pltpu.MemorySpace.SMEM),
            pl.BlockSpec((B, tr, LANES),
                         lambda c, i: (0, jnp.minimum(c * n_half + i,
                                                      n_blocks - 1), 0)),
            pl.BlockSpec((B, tr, LANES),
                         lambda c, i: (0, jnp.minimum(c * n_half + i,
                                                      n_blocks - 1), 0)),
        ],
        out_specs=(
            pl.BlockSpec((1, _SUBLANES, LANES), lambda c, i: (c, 0, 0)),
            pl.BlockSpec((1, _SUBLANES, LANES), lambda c, i: (c, 0, 0)),
        ),
        compiler_params=pltpu.CompilerParams(
            dimension_semantics=("parallel", "arbitrary"),
            vmem_limit_bytes=32 * 1024 * 1024),
    )(threshold, diff3, mask3)

    return jnp.sum(sum_p) / jnp.sum(cnt_p)


def ssi_loss_ref(pred, target, mask):
    """Pure-JAX reference with identical semantics (for verification)."""
    B, C, H, W = pred.shape
    N = C * H * W
    p = pred.reshape(B, N).astype(jnp.float32)
    t = target.reshape(B, N).astype(jnp.float32)
    m = mask.reshape(B, N).astype(jnp.float32)
    med_idx = (N - 1) // 2
    tp = jnp.sort(p, axis=1)[:, med_idx:med_idx + 1]
    tt = jnp.sort(t, axis=1)[:, med_idx:med_idx + 1]
    sp = jnp.mean(jnp.abs(p - tp), axis=1, keepdims=True)
    st = jnp.mean(jnp.abs(t - tt), axis=1, keepdims=True)
    diff = ((p - tp) / sp - (t - tt) / st) ** 2
    flat = jnp.sort(diff.reshape(-1))
    M = B * N
    pos = 0.5 * (M - 1)
    lo = int(math.floor(pos))
    hi = int(math.ceil(pos))
    frac = pos - lo
    thr = (1.0 - frac) * flat[lo] + frac * flat[hi]
    dm = diff * m
    keep = dm < thr
    return jnp.sum(jnp.where(keep, dm, 0.0)) / jnp.sum(keep)


if __name__ == "__main__":
    key = jax.random.PRNGKey(0)

    def run_case(shape, tile_rows=None):
        k1, k2, k3 = jax.random.split(jax.random.fold_in(key, shape[2]), 3)
        pred = jnp.abs(jax.random.normal(k1, shape, dtype=jnp.float32)) + 0.1
        target = jnp.abs(jax.random.normal(k2, shape, dtype=jnp.float32)) + 0.1
        mask = (jax.random.uniform(k3, shape) > 0.3).astype(jnp.float32)

        loss = ssi_loss(pred, target, mask, tile_rows=tile_rows)
        jax.block_until_ready(loss)
        loss_ref = ssi_loss_ref(pred, target, mask)
        jax.block_until_ready(loss_ref)

        assert jnp.isfinite(loss), f"non-finite loss for {shape}: {loss}"
        assert jnp.allclose(loss, loss_ref, rtol=2e-5, atol=1e-6), (
            shape, float(loss), float(loss_ref))

    # Module-consistent small shape (single-block, clamped-second-core path).
    run_case((2, 4, 16, 16))
    # tile_rows=32 forces multi-step grids (kernel 1: 4 steps, kernel 2: (2,2))
    # so the resident accumulator, validity masking and 2-way core split are
    # all exercised; production sizes use the auto ~2 MiB tile.
    run_case((2, 4, 64, 64), tile_rows=32)

    print("KERNEL_OK")
</pallas_src>

<mosaic_0001>
module attributes {stable_mosaic.version = 11 : i64} {
  func.func @_align_diff_kernel(%arg0: i32, %arg1: memref<2x32x128xf32, #tpu.memory_space<vmem>>, %arg2: memref<2x32x128xf32, #tpu.memory_space<vmem>>, %arg3: memref<2x1x1xf32, #tpu.memory_space<vmem>>, %arg4: memref<2x1x1xf32, #tpu.memory_space<vmem>>, %arg5: memref<2x1x1xf32, #tpu.memory_space<vmem>>, %arg6: memref<2x1x1xf32, #tpu.memory_space<vmem>>, %arg7: memref<2x32x128xf32, #tpu.memory_space<vmem>>) attributes {dimension_semantics = [#tpu.dimension_semantics<parallel>], iteration_bounds = array<i64: 1>, scalar_prefetch = 0 : i64, scratch_operands = 0 : i64, tpu.core_type = #tpu.core_type<tc>, window_params = [{transform_indices = @transform_0, window_bounds = array<i64: 2, 32, 128>}, {transform_indices = @transform_1, window_bounds = array<i64: 2, 32, 128>}, {pipeline_mode = #tpu.pipeline_mode<synchronous>, transform_indices = @transform_2, window_bounds = array<i64: 2, 1, 1>}, {pipeline_mode = #tpu.pipeline_mode<synchronous>, transform_indices = @transform_3, window_bounds = array<i64: 2, 1, 1>}, {pipeline_mode = #tpu.pipeline_mode<synchronous>, transform_indices = @transform_4, window_bounds = array<i64: 2, 1, 1>}, {pipeline_mode = #tpu.pipeline_mode<synchronous>, transform_indices = @transform_5, window_bounds = array<i64: 2, 1, 1>}, {transform_indices = @transform_6, window_bounds = array<i64: 2, 32, 128>}]} {
    %c0 = arith.constant 0 : index
    %c0_0 = arith.constant 0 : index
    %c0_1 = arith.constant 0 : index
    %0 = vector.load %arg1[%c0, %c0_0, %c0_1] : memref<2x32x128xf32, #tpu.memory_space<vmem>>, vector<2x32x128xf32>
    %c0_2 = arith.constant 0 : index
    %c0_3 = arith.constant 0 : index
    %c0_4 = arith.constant 0 : index
    %1 = vector.load %arg2[%c0_2, %c0_3, %c0_4] : memref<2x32x128xf32, #tpu.memory_space<vmem>>, vector<2x32x128xf32>
    %c0_5 = arith.constant 0 : index
    %c0_6 = arith.constant 0 : index
    %c0_7 = arith.constant 0 : index
    %2 = vector.load %arg3[%c0_5, %c0_6, %c0_7] : memref<2x1x1xf32, #tpu.memory_space<vmem>>, vector<2x1x1xf32>
    %3 = vector.broadcast %2 : vector<2x1x1xf32> to vector<2x32x128xf32>
    %4 = arith.subf %0, %3 : vector<2x32x128xf32>
    %c0_8 = arith.constant 0 : index
    %c0_9 = arith.constant 0 : index
    %c0_10 = arith.constant 0 : index
    %5 = vector.load %arg5[%c0_8, %c0_9, %c0_10] : memref<2x1x1xf32, #tpu.memory_space<vmem>>, vector<2x1x1xf32>
    %6 = vector.broadcast %5 : vector<2x1x1xf32> to vector<2x32x128xf32>
    %7 = arith.mulf %4, %6 : vector<2x32x128xf32>
    %c0_11 = arith.constant 0 : index
    %c0_12 = arith.constant 0 : index
    %c0_13 = arith.constant 0 : index
    %8 = vector.load %arg4[%c0_11, %c0_12, %c0_13] : memref<2x1x1xf32, #tpu.memory_space<vmem>>, vector<2x1x1xf32>
    %9 = vector.broadcast %8 : vector<2x1x1xf32> to vector<2x32x128xf32>
    %10 = arith.subf %1, %9 : vector<2x32x128xf32>
    %c0_14 = arith.constant 0 : index
    %c0_15 = arith.constant 0 : index
    %c0_16 = arith.constant 0 : index
    %11 = vector.load %arg6[%c0_14, %c0_15, %c0_16] : memref<2x1x1xf32, #tpu.memory_space<vmem>>, vector<2x1x1xf32>
    %12 = vector.broadcast %11 : vector<2x1x1xf32> to vector<2x32x128xf32>
    %13 = arith.mulf %10, %12 : vector<2x32x128xf32>
    %14 = arith.subf %7, %13 : vector<2x32x128xf32>
    %15 = arith.mulf %14, %14 : vector<2x32x128xf32>
    %c0_17 = arith.constant 0 : index
    %c0_18 = arith.constant 0 : index
    %c0_19 = arith.constant 0 : index
    %16 = vector.load %arg7[%c0_17, %c0_18, %c0_19] : memref<2x32x128xf32, #tpu.memory_space<vmem>>, vector<2x32x128xf32>
    tpu.vector_store %arg7[%c0_17, %c0_18, %c0_19], %15 {strides = array<i32>} : memref<2x32x128xf32, #tpu.memory_space<vmem>>, vector<2x32x128xf32>,
    return
  }
  func.func @transform_0(%arg0: i32) -> (i32, i32, i32) {
    %c0_i32 = arith.constant 0 : i32
    %c0_i32_0 = arith.constant 0 : i32
    %c0_i32_1 = arith.constant 0 : i32
    return %c0_i32, %arg0, %c0_i32_0 : i32, i32, i32
  }
  func.func @transform_1(%arg0: i32) -> (i32, i32, i32) {
    %c0_i32 = arith.constant 0 : i32
    %c0_i32_0 = arith.constant 0 : i32
    %c0_i32_1 = arith.constant 0 : i32
    return %c0_i32, %arg0, %c0_i32_0 : i32, i32, i32
  }
  func.func @transform_2(%arg0: i32) -> (i32, i32, i32) {
    %c0_i32 = arith.constant 0 : i32
    %c0_i32_0 = arith.constant 0 : i32
    %c0_i32_1 = arith.constant 0 : i32
    %c0_i32_2 = arith.constant 0 : i32
    return %c0_i32, %c0_i32_0, %c0_i32_1 : i32, i32, i32
  }
  func.func @transform_3(%arg0: i32) -> (i32, i32, i32) {
    %c0_i32 = arith.constant 0 : i32
    %c0_i32_0 = arith.constant 0 : i32
    %c0_i32_1 = arith.constant 0 : i32
    %c0_i32_2 = arith.constant 0 : i32
    return %c0_i32, %c0_i32_0, %c0_i32_1 : i32, i32, i32
  }
  func.func @transform_4(%arg0: i32) -> (i32, i32, i32) {
    %c0_i32 = arith.constant 0 : i32
    %c0_i32_0 = arith.constant 0 : i32
    %c0_i32_1 = arith.constant 0 : i32
    %c0_i32_2 = arith.constant 0 : i32
    return %c0_i32, %c0_i32_0, %c0_i32_1 : i32, i32, i32
  }
  func.func @transform_5(%arg0: i32) -> (i32, i32, i32) {
    %c0_i32 = arith.constant 0 : i32
    %c0_i32_0 = arith.constant 0 : i32
    %c0_i32_1 = arith.constant 0 : i32
    %c0_i32_2 = arith.constant 0 : i32
    return %c0_i32, %c0_i32_0, %c0_i32_1 : i32, i32, i32
  }
  func.func @transform_6(%arg0: i32) -> (i32, i32, i32) {
    %c0_i32 = arith.constant 0 : i32
    %c0_i32_0 = arith.constant 0 : i32
    %c0_i32_1 = arith.constant 0 : i32
    return %c0_i32, %arg0, %c0_i32_0 : i32, i32, i32
  }
}

</mosaic_0001>

<bundles_post_ra>
// kernel: tpu_custom_call.1
= control target key start
LH: loop header
LB: loop body
LE: loop exit
PB: predicated region body
PF: predicated region fallthrough
CT: control target
= control target key end

     0   :  { %11 = vsyncpa [#allocation3], 0  ;;  %s420_s0 = inlined_call_operand.hbm [shape: f32[2,32,128], index: 0, kind: input, shape index: {}]   ;;  %s421_s1 = inlined_call_operand.hbm [shape: f32[2,32,128], index: 1, kind: input, shape index: {}]   ;;  %s422_s2 = inlined_call_operand.vmem [shape: f32[2,1,1], index: 2, kind: input, shape index: {}]   ;;  %s423_s3 = inlined_call_operand.vmem [shape: f32[2,1,1], index: 3, kind: input, shape index: {}]   ;;  %s424_s4 = inlined_call_operand.vmem [shape: f32[2,1,1], index: 4, kind: input, shape index: {}]   ;;  %s425_s5 = inlined_call_operand.vmem [shape: f32[2,1,1], index: 5, kind: input, shape index: {}]   ;;  %s426_s6 = inlined_call_operand.hbm [shape: f32[2,32,128], index: 6, kind: output, shape index: {}]  }
   0x1   :  { %12 = vsyncpa [#allocation6], 0 }
   0x2   :  { %13 = vsyncpa [#allocation4], 0  ;;  %s310_s21 = smov [#allocation2]   ;;  %s238_s25 = scalar_lea.hbm %s420_s0, 1024 }
   0x3   :  { %s19_s22 = sshll.u32 %s310_s21, 4  ;;  %p239_p0 = scmp.ne.s32.totalorder %s420_s0, %s238_s25  ;;  %s20_s22 = int_to_ptr.vmem [resolvable:$true] %s19_s22 }
   0x4   :  { %p242_p1 = scmp.lt.u32.totalorder %s238_s25, %s420_s0 }
   0x6   :  { %p244_p2 = pnand %p242_p1, %p239_p0 }
   0x8   :  { %247 = shalt.err (!%p244_p2)
}
   0x9   :  { %s248_s30 = scalar_lea.vmem %s20_s22, 1024  ;;  %p253_p4 = scmp.lt.s32.totalorder %s20_s22, %s20_s22 }
   0xa   :  { %p249_p3 = scmp.ne.s32.totalorder %s20_s22, %s248_s30  ;;  %p254_p5 = scmp.lt.s32.totalorder %s248_s30, %s248_s30 }
   0xc   :  { %p255_p6 = por %p254_p5, %p253_p4 }
   0xe   :  { %p256_p7 = pnand %p255_p6, %p249_p3 }
  0x10   :  { %259 = shalt.err (!%p256_p7)
}
  0x11   :  { %s311_s7 = smov 128   ;;  %s312_s8 = smov 8  }
  0x12   :  { %25 = dma.hbm_to_vmem [thread:$0]  %s420_s0, 1024, %s20_s22, [#allocation3], %s311_s7, %s311_s7, %s312_s8  }
  0x13   :  { %s313_s11 = smov [#allocation5]   ;;  %s260_s15 = scalar_lea.hbm %s421_s1, 1024 }
  0x14   :  { %s31_s12 = sshll.u32 %s313_s11, 4  ;;  %p261_p8 = scmp.ne.s32.totalorder %s421_s1, %s260_s15  ;;  %s32_s12 = int_to_ptr.vmem [resolvable:$true] %s31_s12 }
  0x15   :  { %p264_p9 = scmp.lt.u32.totalorder %s260_s15, %s421_s1 }
  0x17   :  { %p266_p10 = pnand %p264_p9, %p261_p8 }
  0x19   :  { %269 = shalt.err (!%p266_p10)
}
  0x1a   :  { %s270_s20 = scalar_lea.vmem %s32_s12, 1024  ;;  %p275_p12 = scmp.lt.s32.totalorder %s32_s12, %s32_s12 }
  0x1b   :  { %p271_p11 = scmp.ne.s32.totalorder %s32_s12, %s270_s20  ;;  %p276_p13 = scmp.lt.s32.totalorder %s270_s20, %s270_s20 }
  0x1d   :  { %p277_p0 = por %p276_p13, %p275_p12 }
  0x1f   :  { %p278_p1 = pnand %p277_p0, %p271_p11 }
  0x21   :  { %281 = shalt.err (!%p278_p1)
}
  0x22   :  { %37 = dma.hbm_to_vmem [thread:$0]  %s421_s1, 1024, %s32_s12, [#allocation6], %s311_s7, %s311_s7, %s312_s8  }
  0x23   :  { %304 = dma.done.wait [#allocation3], 1024  }
  0x24   :  { %305 = vsyncadd [#allocation3], 4294966272 }
  0x25   :  { %306 = dma.done.wait [#allocation6], 1024  }
  0x26   :  { %307 = vsyncadd [#allocation6], 4294966272  ;;  %v314_v0 = vmov 0   ;;  %v226_v1 = vld [vmem:[%s423_s3] ss:$0 sm:$0xff]  ;;  %v53_v12 = vld [vmem:[#allocation2 + $0x8] sm:$0xff] }
  0x27   :  { %237 = vset.pattern.permute.xlu1 %v314_v0  ;;  %236 = vset.pattern.permute.xlu0 %v314_v0  ;;  %v222_v2 = vld [vmem:[%s422_s2] ss:$0 sm:$0xff]  ;;  %v227_v3 = vld [vmem:[%s423_s3 + $0x1] ss:$0 sm:$0xff]  ;;  %v54_v13 = vld [vmem:[#allocation2 + $0x10] sm:$0xff] }
  0x28   :  { %137 = vperm.xlu1 %237, %v226_v1   ;;  %81 = vperm.xlu0 %236, %v222_v2   ;;  %v223_v4 = vld [vmem:[%s422_s2 + $0x1] ss:$0 sm:$0xff]  ;;  %v224_v6 = vld [vmem:[%s424_s4] ss:$0 sm:$0xff]  ;;  %v55_v14 = vld [vmem:[#allocation2 + $0x18] sm:$0xff]  ;;  %s315_s2 = smov [#allocation7]  }
  0x29   :  { %v225_v5 = vld [vmem:[%s424_s4 + $0x1] ss:$0 sm:$0xff]  ;;  %v228_v8 = vld [vmem:[%s425_s5] ss:$0 sm:$0xff]  ;;  %v57_v18 = vld [vmem:[#allocation2 + $0x28] sm:$0xff]  ;;  %s209_s4 = sshll.u32 %s315_s2, 4  ;;  %s210_s4 = int_to_ptr.vmem [resolvable:$true] %s209_s4 }
  0x2a   :  { %v229_v7 = vld [vmem:[%s425_s5 + $0x1] ss:$0 sm:$0xff]  ;;  %v61_v20 = vld [vmem:[#allocation5 + $0x8] sm:$0xff]  ;;  %v62_v21 = vld [vmem:[#allocation5 + $0x10] sm:$0xff]  ;;  %s282_s5 = scalar_lea.vmem %s210_s4, 1024  ;;  %p287_p3 = scmp.lt.s32.totalorder %s210_s4, %s210_s4 }
  0x2b   :  { %v52_v11 = vld [vmem:[#allocation2] sm:$0xff]  ;;  %v63_v22 = vld [vmem:[#allocation5 + $0x18] sm:$0xff]  ;;  %v58_v23 = vld [vmem:[#allocation2 + $0x30] sm:$0xff]  ;;  %p283_p2 = scmp.ne.s32.totalorder %s210_s4, %s282_s5  ;;  %p288_p4 = scmp.lt.s32.totalorder %s282_s5, %s282_s5 }
  0x2c   :  { %141 = vperm.xlu1 %237, %v227_v3   ;;  %85 = vperm.xlu0 %236, %v223_v4   ;;  %v56_v17 = vld [vmem:[#allocation2 + $0x20] sm:$0xff]  ;;  %v59_v24 = vld [vmem:[#allocation2 + $0x38] sm:$0xff]  ;;  %v65_v30 = vld [vmem:[#allocation5 + $0x28] sm:$0xff] }
  0x2d   :  { %v60_v19 = vld [vmem:[#allocation5] sm:$0xff]  ;;  %v66_v31 = vld [vmem:[#allocation5 + $0x30] sm:$0xff]  ;;  %v67_v32 = vld [vmem:[#allocation5 + $0x38] sm:$0xff]  ;;  %p289_p5 = por %p288_p4, %p287_p3 }
  0x2e   :  { %v64_v25 = vld [vmem:[#allocation5 + $0x20] sm:$0xff] }
  0x2f   :  { %p290_p6 = pnand %p289_p5, %p283_p2 }
  0x30   :  { %113 = vperm.xlu1 %237, %v225_v5   ;;  %109 = vperm.xlu0 %236, %v224_v6  }
  0x34   :  { %169 = vperm.xlu1 %237, %v229_v7   ;;  %165 = vperm.xlu0 %236, %v228_v8  }
  0xa7   :  { %v138_v9 = vpop.permute.xlu1 %137  ;;  %v82_v10 = vpop.permute.xlu0 %81 }
  0xa8   :  { %v88_v26 = vsub.f32 %v52_v11, %v82_v10  ;;  %v89_v27 = vsub.f32 %v53_v12, %v82_v10  ;;  %v90_v28 = vsub.f32 %v54_v13, %v82_v10  ;;  %v91_v29 = vsub.f32 %v55_v14, %v82_v10 }
  0xa9   :  { %v144_v35 = vsub.f32 %v60_v19, %v138_v9  ;;  %v145_v36 = vsub.f32 %v61_v20, %v138_v9  ;;  %v146_v37 = vsub.f32 %v62_v21, %v138_v9  ;;  %v147_v38 = vsub.f32 %v63_v22, %v138_v9 }
  0xab   :  { %v142_v15 = vpop.permute.xlu1 %141  ;;  %v86_v16 = vpop.permute.xlu0 %85 }
  0xac   :  { %v92_v39 = vsub.f32 %v56_v17, %v86_v16  ;;  %v93_v40 = vsub.f32 %v57_v18, %v86_v16  ;;  %v94_v41 = vsub.f32 %v58_v23, %v86_v16  ;;  %v95_v42 = vsub.f32 %v59_v24, %v86_v16 }
  0xad   :  { %v148_v43 = vsub.f32 %v64_v25, %v142_v15  ;;  %v149_v44 = vsub.f32 %v65_v30, %v142_v15  ;;  %v150_v45 = vsub.f32 %v66_v31, %v142_v15  ;;  %v151_v46 = vsub.f32 %v67_v32, %v142_v15 }
  0xaf   :  { %v114_v33 = vpop.permute.xlu1 %113  ;;  %v110_v34 = vpop.permute.xlu0 %109 }
  0xb0   :  { %v120_v47 = vmul.f32 %v114_v33, %v92_v39  ;;  %v121_v48 = vmul.f32 %v114_v33, %v93_v40  ;;  %v122_v49 = vmul.f32 %v114_v33, %v94_v41  ;;  %v123_v50 = vmul.f32 %v114_v33, %v95_v42 }
  0xb1   :  { %v116_v51 = vmul.f32 %v110_v34, %v88_v26  ;;  %v117_v52 = vmul.f32 %v110_v34, %v89_v27  ;;  %v118_v53 = vmul.f32 %v110_v34, %v90_v28  ;;  %v119_v54 = vmul.f32 %v110_v34, %v91_v29 }
  0xb3   :  { %v170_v55 = vpop.permute.xlu1 %169  ;;  %v166_v56 = vpop.permute.xlu0 %165 }
  0xb4   :  { %v176_v57 = vmul.f32 %v170_v55, %v148_v43  ;;  %v177_v58 = vmul.f32 %v170_v55, %v149_v44  ;;  %v178_v59 = vmul.f32 %v170_v55, %v150_v45  ;;  %v179_v60 = vmul.f32 %v170_v55, %v151_v46 }
  0xb5   :  { %v172_v61 = vmul.f32 %v166_v56, %v144_v35  ;;  %v173_v62 = vmul.f32 %v166_v56, %v145_v36  ;;  %v174_v63 = vmul.f32 %v166_v56, %v146_v37  ;;  %v175_v0 = vmul.f32 %v166_v56, %v147_v38 }
  0xb6   :  { %v184_v1 = vsub.f32 %v120_v47, %v176_v57  ;;  %v185_v2 = vsub.f32 %v121_v48, %v177_v58  ;;  %v186_v3 = vsub.f32 %v122_v49, %v178_v59  ;;  %v187_v4 = vsub.f32 %v123_v50, %v179_v60 }
  0xb7   :  { %v180_v5 = vsub.f32 %v116_v51, %v172_v61  ;;  %v181_v6 = vsub.f32 %v117_v52, %v173_v62  ;;  %v182_v7 = vsub.f32 %v118_v53, %v174_v63  ;;  %v183_v8 = vsub.f32 %v119_v54, %v175_v0 }
  0xb8   :  { %v192_v9 = vmul.f32 %v184_v1, %v184_v1  ;;  %v193_v10 = vmul.f32 %v185_v2, %v185_v2  ;;  %v194_v11 = vmul.f32 %v186_v3, %v186_v3  ;;  %v195_v12 = vmul.f32 %v187_v4, %v187_v4 }
  0xb9   :  { %v188_v13 = vmul.f32 %v180_v5, %v180_v5  ;;  %v189_v14 = vmul.f32 %v181_v6, %v181_v6  ;;  %v190_v15 = vmul.f32 %v182_v7, %v182_v7  ;;  %v191_v16 = vmul.f32 %v183_v8, %v183_v8 }
  0xba   :  { %200 = vst [vmem:[#allocation7 + $0x20] sm:$0xff] %v192_v9  ;;  %201 = vst [vmem:[#allocation7 + $0x28] sm:$0xff] %v193_v10 }
  0xbb   :  { %202 = vst [vmem:[#allocation7 + $0x30] sm:$0xff] %v194_v11  ;;  %203 = vst [vmem:[#allocation7 + $0x38] sm:$0xff] %v195_v12 }
  0xbc   :  { %196 = vst [vmem:[#allocation7] sm:$0xff] %v188_v13  ;;  %197 = vst [vmem:[#allocation7 + $0x8] sm:$0xff] %v189_v14 }
  0xbd   :  { %198 = vst [vmem:[#allocation7 + $0x10] sm:$0xff] %v190_v15  ;;  %199 = vst [vmem:[#allocation7 + $0x18] sm:$0xff] %v191_v16 }
  0xbe   :  { %293 = shalt.err (!%p290_p6)
}
  0xbf   :  { %s294_s16 = scalar_lea.hbm %s426_s6, 1024 }
  0xc0   :  { %p295_p7 = scmp.ne.s32.totalorder %s426_s6, %s294_s16  ;;  %p298_p8 = scmp.lt.u32.totalorder %s294_s16, %s426_s6 }
  0xc2   :  { %p300_p9 = pnand %p298_p8, %p295_p7 }
  0xc4   :  { %303 = shalt.err (!%p300_p9)
}
  0xc5   :  { %215 = dma.vmem_to_hbm [thread:$0]  %s210_s4, 1024, %s426_s6, [#allocation4], %s311_s7, %s311_s7, %s312_s8  }
  0xc6   :  { %308 = dma.done.wait [#allocation4], 1024  }
  0xc7   :  { %309 = vsyncadd [#allocation4], 4294966272 }
  0xc8   :  { %219 = vsyncpa [#allocation3], 1 }
  0xc9   :  { %220 = vsyncpa [#allocation6], 1 }
  0xca   :  { %221 = vsyncpa [#allocation4], 1 }

</bundles_post_ra>
